<compile_context>
chip_gen: v5e
topology: v5e:2x2
jax: 0.10.0
libtpu: 0.0.40
codegen_flags: <defaults>
</compile_context>

<pallas_src>
import jax
import jax.numpy as jnp
from jax.experimental import pallas as pl
from jax.experimental.pallas import tpu as pltpu


def _identity_kernel(x_ref, o_ref):
    # Pure pass-through: copy the current VMEM tile.
    o_ref[...] = x_ref[...]


def _pick_lanes(n):
    """Largest lane width in {1024, 512, 256, 128} that divides n, else None."""
    for lanes in (1024, 512, 256, 128):
        if n % lanes == 0:
            return lanes
    return None


def _sublane_pack(dtype):
    """Rows per packed vreg sublane group for this dtype (8/16/32)."""
    itemsize = jnp.dtype(dtype).itemsize
    if itemsize >= 4:
        return 8
    if itemsize == 2:
        return 16
    return 32


def _tpu_block_budget():
    """Return (target_block_bytes, vmem_limit_bytes_or_None), gated by chip."""
    try:
        vmem_cap = int(pltpu.get_tpu_info().vmem_capacity_bytes)
    except Exception:
        vmem_cap = None
    if vmem_cap is not None and vmem_cap >= 64 * 1024 * 1024:
        # v5e/v6e (128 MiB physical) / v7x (64 MiB physical): 4 MiB blocks.
        # in + out, double-buffered => ~16 MiB; raise the scoped limit
        # explicitly so the per-chip defaults (16/32 MiB) are not binding.
        target = 4 * 1024 * 1024
        limit = min(48 * 1024 * 1024, (vmem_cap * 3) // 4)
        return target, limit
    # Unknown / small-VMEM chip: conservative defaults, no explicit limit.
    return 2 * 1024 * 1024, None


def identity(x, use_pallas=True):
    """Identity forward pass.

    With use_pallas=False (or for zero-element inputs) this is a metadata-only
    pass-through — the optimal implementation of nn.Identity.  The default
    path runs a roofline-tuned Pallas streaming-copy kernel.
    """
    if not use_pallas or x.size == 0:
        # JAX arrays are immutable, so returning x preserves Identity
        # semantics exactly with zero HBM traffic.
        return x

    orig_shape = x.shape
    n = x.size
    itemsize = jnp.dtype(x.dtype).itemsize
    target_block_bytes, vmem_limit = _tpu_block_budget()

    lanes = _pick_lanes(n)
    if lanes is not None:
        # Lane-dense slab: full-width vector stores, best store-slot util.
        x2 = x.reshape(-1, lanes)
    elif n * itemsize <= target_block_bytes:
        # Small, non-128-divisible: a single full-extent (1, n) block is legal
        # and stays on the unmasked-store path.
        x2 = x.reshape(1, n)
    else:
        # Large and not 128-divisible: keep original last dim as the lane dim
        # (correct, narrower store path).
        # TODO(synk): split into a 128-divisible prefix + tiny remainder to
        # keep unmasked stores for this (rare) case.
        last = orig_shape[-1] if x.ndim > 0 and orig_shape[-1] > 0 else 1
        x2 = x.reshape(-1, last)

    R, C = x2.shape

    # Row tiles sized by bytes and rounded to the dtype's sublane packing, or
    # full extent if everything fits in one block (full extent is always legal
    # w.r.t. the (8,128) rule).
    pack = _sublane_pack(x2.dtype)
    bytes_per_row = max(C * itemsize, 1)
    rows_for_target = max(pack, (target_block_bytes // bytes_per_row) // pack * pack)
    tr = R if R <= rows_for_target else rows_for_target

    grid_steps = pl.cdiv(R, tr)

    # Megacore sharding (v7x) only pays off with more than one tile of work.
    cp_kwargs = dict(
        dimension_semantics=(("parallel",) if grid_steps > 1 else ("arbitrary",)))
    if vmem_limit is not None:
        cp_kwargs["vmem_limit_bytes"] = int(vmem_limit)

    out2 = pl.pallas_call(
        _identity_kernel,
        out_shape=jax.ShapeDtypeStruct((R, C), x2.dtype),
        grid_spec=pltpu.PrefetchScalarGridSpec(
            num_scalar_prefetch=0,
            grid=(grid_steps,),
            in_specs=[pl.BlockSpec((tr, C), lambda i: (i, 0))],
            out_specs=pl.BlockSpec((tr, C), lambda i: (i, 0)),
        ),
        # Output aliases the input: no second HBM allocation when the caller's
        # buffer is donatable at the enclosing jit boundary.
        input_output_aliases={0: 0},
        # Pure-bandwidth op: help XLA overlap it with neighboring compute.
        cost_estimate=pl.CostEstimate(
            flops=0, transcendentals=0, bytes_accessed=2 * n * itemsize),
        compiler_params=pltpu.CompilerParams(**cp_kwargs),
    )(x2)

    return out2.reshape(orig_shape)


if __name__ == "__main__":
    key = jax.random.PRNGKey(0)

    # NCHW input consistent with a conv-net module: batch=2, channels=4, 16x16.
    x = jax.random.normal(key, (2, 4, 16, 16), dtype=jnp.float32)
    y = identity(x)
    jax.block_until_ready(y)
    assert y.shape == x.shape and y.dtype == x.dtype
    assert bool(jnp.all(y == x))

    # Non-128-divisible path: now a single full-extent (1, 15) block.
    x_odd = jax.random.normal(jax.random.PRNGKey(1), (3, 5), dtype=jnp.float32)
    y_odd = identity(x_odd)
    jax.block_until_ready(y_odd)
    assert y_odd.shape == x_odd.shape and bool(jnp.all(y_odd == x_odd))

    # Narrow dtype path exercises the sublane-pack-aware row rounding.
    x_bf16 = jax.random.normal(jax.random.PRNGKey(2), (4, 256), dtype=jnp.bfloat16)
    y_bf16 = identity(x_bf16)
    jax.block_until_ready(y_bf16)
    assert y_bf16.shape == x_bf16.shape and bool(jnp.all(y_bf16 == x_bf16))

    # Metadata-only short-circuit (the true Identity fast path).
    y_fast = identity(x, use_pallas=False)
    assert y_fast is x

    print("KERNEL_OK")
</pallas_src>

<mosaic_0001>
module attributes {stable_mosaic.version = 11 : i64} {
  func.func @_identity_kernel(%arg0: i32, %arg1: memref<2x1024xf32, #tpu.memory_space<vmem>>, %arg2: memref<2x1024xf32, #tpu.memory_space<vmem>>) attributes {dimension_semantics = [#tpu.dimension_semantics<arbitrary>], iteration_bounds = array<i64: 1>, scalar_prefetch = 0 : i64, scratch_operands = 0 : i64, tpu.core_type = #tpu.core_type<tc>, window_params = [{transform_indices = @transform_0, window_bounds = array<i64: 2, 1024>}, {transform_indices = @transform_1, window_bounds = array<i64: 2, 1024>}]} {
    %c0 = arith.constant 0 : index
    %c0_0 = arith.constant 0 : index
    %0 = vector.load %arg1[%c0, %c0_0] : memref<2x1024xf32, #tpu.memory_space<vmem>>, vector<2x1024xf32>
    %c0_1 = arith.constant 0 : index
    %c0_2 = arith.constant 0 : index
    %1 = vector.load %arg2[%c0_1, %c0_2] : memref<2x1024xf32, #tpu.memory_space<vmem>>, vector<2x1024xf32>
    tpu.vector_store %arg2[%c0_1, %c0_2], %0 {strides = array<i32>} : memref<2x1024xf32, #tpu.memory_space<vmem>>, vector<2x1024xf32>,
    return
  }
  func.func @transform_0(%arg0: i32) -> (i32, i32) {
    %c0_i32 = arith.constant 0 : i32
    %c0_i32_0 = arith.constant 0 : i32
    return %arg0, %c0_i32 : i32, i32
  }
  func.func @transform_1(%arg0: i32) -> (i32, i32) {
    %c0_i32 = arith.constant 0 : i32
    %c0_i32_0 = arith.constant 0 : i32
    return %arg0, %c0_i32 : i32, i32
  }
}

</mosaic_0001>

<bundles_post_ra>
// kernel: tpu_custom_call.1
= control target key start
LH: loop header
LB: loop body
LE: loop exit
PB: predicated region body
PF: predicated region fallthrough
CT: control target
= control target key end

     0   :  { %6 = vsyncpa [#allocation3], 0  ;;  %s116_s0 = inlined_call_operand.hbm [shape: f32[2,1024], index: 0, kind: input, shape index: {}, may-alias: {0,1}]   ;;  %s117_s1 = inlined_call_operand.hbm [shape: f32[2,1024], index: 1, kind: output, shape index: {}, may-alias: {0,1}]  }
   0x1   :  { %7 = vsyncpa [#allocation4], 0  ;;  %s13_s8 = sshll.u32 %s116_s0, 4  ;;  %s98_s9 = smov [#allocation2]   ;;  %s14_s8 = int_to_ptr.hbm [resolvable:$true] %s13_s8 }
   0x2   :  { %s15_s10 = sshll.u32 %s98_s9, 4  ;;  %s16_s10 = int_to_ptr.vmem [resolvable:$true] %s15_s10 }
   0x3   :  { %18 = dma.hbm_to_vmem [thread:$0]  %s14_s8, 256, %s16_s10, [#allocation3]  }
   0x4   :  { %94 = dma.done.wait [#allocation3], 256  }
   0x5   :  { %95 = vsyncadd [#allocation3], 4294967040  ;;  %s99_s11 = smov [#allocation5]   ;;  %s34_s15 = sshll.u32 %s117_s1, 4  ;;  %v23_v0 = vld [vmem:[#allocation2] sm:$0xff]  ;;  %v24_v1 = vld [vmem:[#allocation2 + $0x8] sm:$0xff]  ;;  %s35_s15 = int_to_ptr.hbm [resolvable:$true] %s34_s15 }
   0x6   :  { %s32_s12 = sshll.u32 %s99_s11, 4  ;;  %25 = vst [vmem:[#allocation5] sm:$0xff] %v23_v0  ;;  %s33_s12 = int_to_ptr.vmem [resolvable:$true] %s32_s12 }
   0x7   :  { %26 = vst [vmem:[#allocation5 + $0x8] sm:$0xff] %v24_v1 }
   0x8   :  { %37 = dma.vmem_to_hbm [thread:$0]  %s33_s12, 256, %s35_s15, [#allocation4]  }
   0x9   :  { %96 = dma.done.wait [#allocation4], 256  }
   0xa   :  { %97 = vsyncadd [#allocation4], 4294967040 }
   0xb   :  { %42 = vsyncpa [#allocation3], 1 }
   0xc   :  { %43 = vsyncpa [#allocation4], 1 }

</bundles_post_ra>
